<compile_context>
chip_gen: v6e
topology: v6e:2x2x1
jax: 0.10.0
libtpu: 0.0.40
codegen_flags: <defaults>
</compile_context>

<pallas_src>
import functools
from typing import NamedTuple

import jax
import jax.numpy as jnp
from jax import lax
from jax.experimental import pallas as pl
from jax.experimental.pallas import tpu as pltpu


def _round_up(x, m):
    return ((x + m - 1) // m) * m


def _cdiv(a, b):
    return -(-a // b)


def _pad2(a, rows, cols):
    r, c = a.shape
    return jnp.pad(a, ((0, rows - r), (0, cols - c)))


def _device_vmem_bytes():
    # Conservative fallback = v7x per-TensorCore VMEM (fits every generation).
    try:
        return int(pltpu.get_tpu_info().vmem_capacity_bytes)
    except Exception:
        return 64 << 20


class PreparedParams(NamedTuple):
    """Lane-aligned, zero-padded weights.  Build once with prepare_params()."""
    w0: jax.Array
    b0: jax.Array
    w1: jax.Array
    b1: jax.Array
    w2: jax.Array
    b2: jax.Array
    obs_dim: int
    hidden: int
    action_dim: int
    split_at: int  # 0 -> masked squash; else lane boundary where log_std starts


def prepare_params(params, dtype=None):
    """Pad weights to (8,128)-friendly shapes ONCE (call outside the hot loop).

    params = (w0, b0, w1, b1, w2, b2) with y = x @ W + b layout (transpose of
    torch.nn.Linear.weight); w2 is the fused final layer (hidden, 2*action_dim).
    dtype: optional weight cast (e.g. jnp.bfloat16 -- recommended on v5e/v6e/v7x:
    only the MXU sees bf16, accumulation and elementwise stay f32)."""
    w0, b0, w1, b1, w2, b2 = params
    if dtype is not None:
        w0, b0, w1, b1, w2, b2 = (a.astype(dtype) for a in (w0, b0, w1, b1, w2, b2))
    obs_dim, hidden = w0.shape
    two_a = w2.shape[1]
    action_dim = two_a // 2

    D_p = _round_up(obs_dim, 128)
    H_p = _round_up(hidden, 128)
    A_p = _round_up(action_dim, 128)

    # Split layout (mu -> lanes [0, A_p), log_std -> [A_p, 2*A_p)) only when it
    # costs no extra lanes over the fused layout; otherwise keep fused + mask.
    split = (2 * A_p == _round_up(two_a, 128))
    if split:
        O_p = 2 * A_p
        w2_p = jnp.zeros((H_p, O_p), w2.dtype)
        w2_p = w2_p.at[:hidden, :action_dim].set(w2[:, :action_dim])
        w2_p = w2_p.at[:hidden, A_p:A_p + action_dim].set(w2[:, action_dim:])
        b2_p = jnp.zeros((1, O_p), b2.dtype)
        b2_p = b2_p.at[:, :action_dim].set(b2[:, :action_dim])
        b2_p = b2_p.at[:, A_p:A_p + action_dim].set(b2[:, action_dim:])
        split_at = A_p
    else:
        O_p = _round_up(two_a, 128)
        w2_p = _pad2(w2, H_p, O_p)
        b2_p = _pad2(b2, 1, O_p)
        split_at = 0

    return PreparedParams(
        w0=_pad2(w0, D_p, H_p), b0=_pad2(b0, 1, H_p),
        w1=_pad2(w1, H_p, H_p), b1=_pad2(b1, 1, H_p),
        w2=w2_p, b2=b2_p,
        obs_dim=obs_dim, hidden=hidden, action_dim=action_dim, split_at=split_at)


def _actor_kernel(obs_ref,
                  w0_ref, b0_ref,
                  w1_ref, b1_ref,
                  w2_ref, b2_ref,
                  out_ref,
                  *, action_dim, split_at, log_std_min, log_std_max):
    # 3 MXU matmuls on lane-aligned resident weights; f32 accumulation; ReLU on
    # the VPU; tanh on the EUP.  obs arrives already in the weight dtype.
    wdt = w0_ref.dtype

    h = jnp.dot(obs_ref[...], w0_ref[...], preferred_element_type=jnp.float32)
    h = jnp.maximum(h + b0_ref[...].astype(jnp.float32), 0.0)

    h = jnp.dot(h.astype(wdt), w1_ref[...], preferred_element_type=jnp.float32)
    h = jnp.maximum(h + b1_ref[...].astype(jnp.float32), 0.0)

    y = jnp.dot(h.astype(wdt), w2_ref[...], preferred_element_type=jnp.float32)
    y = y + b2_ref[...].astype(jnp.float32)

    def squash(v):
        return log_std_min + 0.5 * (log_std_max - log_std_min) * (jnp.tanh(v) + 1.0)

    if split_at:
        # mu lives in lanes [0, split_at), log_std in [split_at, O_p): slice at a
        # 128-lane (vreg) boundary, no mask, tanh only on the log_std half.
        out_ref[:, :split_at] = y[:, :split_at].astype(out_ref.dtype)
        out_ref[:, split_at:] = squash(y[:, split_at:]).astype(out_ref.dtype)
    else:
        # Small action_dim: squash exactly columns [action_dim, 2*action_dim)
        # via an iota lane mask; mu and padding columns pass through untouched.
        col = lax.broadcasted_iota(jnp.int32, y.shape, 1)
        is_log_std = jnp.logical_and(col >= action_dim, col < 2 * action_dim)
        out_ref[...] = jnp.where(is_log_std, squash(y), y).astype(out_ref.dtype)


def diag_gaussian_actor_forward(obs, params, log_std_bounds, *,
                                batch_tile=None, vmem_limit_bytes=None):
    """obs: (B, obs_dim) -> (mu, log_std), each (B, action_dim) float32.

    `params` is either a raw (w0, b0, w1, b1, w2, b2) tuple or a PreparedParams
    (preferred: call prepare_params() once and reuse it every forward)."""
    if not isinstance(params, PreparedParams):
        params = prepare_params(params)
    p = params

    B, obs_dim = obs.shape
    assert obs_dim == p.obs_dim, f"obs_dim mismatch: {obs_dim} vs {p.obs_dim}"

    wdt = p.w0.dtype
    wsize = jnp.dtype(wdt).itemsize
    D_p, H_p = p.w0.shape
    O_p = p.w2.shape[1]
    two_a = 2 * p.action_dim
    lo, hi = float(log_std_bounds[0]), float(log_std_bounds[1])

    weight_arrays = (p.w0, p.b0, p.w1, p.b1, p.w2, p.b2)
    weight_bytes = sum(int(a.size) * a.dtype.itemsize for a in weight_arrays)

    vmem_cap = _device_vmem_bytes()
    # Per-batch-row VMEM cost at pipeline depth 2: obs + out tiles
    # (double-buffered) plus the live f32 activation slabs in the kernel body.
    per_row = 2 * (D_p * wsize + O_p * 4) + 3 * max(H_p, O_p) * 4
    # Weights held resident (2x buffers allocated by the runtime, traffic 1x).
    budget_rows = int(0.85 * vmem_cap) - 2 * weight_bytes - (4 << 20)
    max_tile = max(8, (budget_rows // per_row) // 8 * 8) if budget_rows > per_row else 8

    if batch_tile is None:
        target = 1024 if vmem_cap >= (100 << 20) else 512   # v5e/v6e vs v7x
        ru = _round_up(B, 8)
        if ru <= 8:
            batch_tile = 8
        else:
            # >= 2 grid steps so ("parallel",) can shard across v7x's 2 TCs and
            # obs/out DMA overlaps compute; minimize padding for a given count.
            n_steps = max(2, _cdiv(ru, target))
            batch_tile = _round_up(_cdiv(ru, n_steps), 8)
        batch_tile = max(8, min(batch_tile, max_tile))
    assert batch_tile % 8 == 0, "batch_tile must be a multiple of 8 (f32 sublane tiling)"

    B_p = _round_up(B, batch_tile)
    n_steps = B_p // batch_tile

    if vmem_limit_bytes is None:
        need = 2 * weight_bytes + batch_tile * per_row + (4 << 20)
        vmem_limit_bytes = int(min(max(need, 32 << 20), int(0.9 * vmem_cap)))

    # obs cast to the weight dtype here (halves obs DMA bytes on the bf16 path);
    # zero padding is exact: padded obs columns hit zero weight rows.
    obs_p = _pad2(obs.astype(wdt), B_p, D_p)

    flops = 2 * B_p * (D_p * H_p + H_p * H_p + H_p * O_p)
    transcendentals = B_p * ((O_p - p.split_at) if p.split_at else O_p)
    bytes_accessed = int(obs_p.size * wsize + B_p * O_p * 4 + weight_bytes)

    kernel = functools.partial(_actor_kernel,
                               action_dim=p.action_dim, split_at=p.split_at,
                               log_std_min=lo, log_std_max=hi)

    row = lambda i: (i, 0)   # tile the batch dimension
    rep = lambda i: (0, 0)   # resident weights: same block every step (fetched once)

    out = pl.pallas_call(
        kernel,
        out_shape=jax.ShapeDtypeStruct((B_p, O_p), jnp.float32),
        grid_spec=pltpu.PrefetchScalarGridSpec(
            num_scalar_prefetch=0,
            grid=(n_steps,),
            in_specs=[
                pl.BlockSpec((batch_tile, D_p), row),
                pl.BlockSpec((D_p, H_p), rep),
                pl.BlockSpec((1, H_p), rep),
                pl.BlockSpec((H_p, H_p), rep),
                pl.BlockSpec((1, H_p), rep),
                pl.BlockSpec((H_p, O_p), rep),
                pl.BlockSpec((1, O_p), rep),
            ],
            out_specs=pl.BlockSpec((batch_tile, O_p), row),
        ),
        compiler_params=pltpu.CompilerParams(
            dimension_semantics=("parallel",),
            vmem_limit_bytes=vmem_limit_bytes),
        cost_estimate=pl.CostEstimate(flops=flops,
                                      transcendentals=int(transcendentals),
                                      bytes_accessed=bytes_accessed),
    )(obs_p, *weight_arrays)

    A = p.action_dim
    if p.split_at:
        mu = out[:B, :A]
        log_std = out[:B, p.split_at:p.split_at + A]
    else:
        yb = out[:B, :two_a]          # single slice of the padded slab
        mu, log_std = yb[:, :A], yb[:, A:]
    return mu, log_std


def init_params(key, obs_dim, hidden_dim, action_dim, dtype=jnp.float32):
    """Deterministic synthetic init (shapes follow utils.mlp with hidden_depth=2).
    Final layer kept fused as (hidden, 2*action_dim): chunk happens in-kernel."""
    ks = jax.random.split(key, 6)
    scale = lambda fan_in: 1.0 / jnp.sqrt(jnp.float32(fan_in))
    w0 = jax.random.normal(ks[0], (obs_dim, hidden_dim), jnp.float32) * scale(obs_dim)
    b0 = jax.random.normal(ks[1], (1, hidden_dim), jnp.float32) * 0.01
    w1 = jax.random.normal(ks[2], (hidden_dim, hidden_dim), jnp.float32) * scale(hidden_dim)
    b1 = jax.random.normal(ks[3], (1, hidden_dim), jnp.float32) * 0.01
    w2 = jax.random.normal(ks[4], (hidden_dim, 2 * action_dim), jnp.float32) * scale(hidden_dim)
    b2 = jax.random.normal(ks[5], (1, 2 * action_dim), jnp.float32) * 0.01
    return tuple(p.astype(dtype) for p in (w0, b0, w1, b1, w2, b2))


def reference_forward(obs, params, log_std_bounds):
    w0, b0, w1, b1, w2, b2 = params
    f32 = lambda a: a.astype(jnp.float32)
    h = jnp.maximum(obs @ f32(w0) + f32(b0), 0.0)
    h = jnp.maximum(h @ f32(w1) + f32(b1), 0.0)
    y = h @ f32(w2) + f32(b2)
    action_dim = w2.shape[1] // 2
    mu, ls = y[:, :action_dim], y[:, action_dim:]
    lo, hi = log_std_bounds
    ls = lo + 0.5 * (hi - lo) * (jnp.tanh(ls) + 1.0)
    return mu, ls


if __name__ == "__main__":
    log_std_bounds = (-10.0, 2.0)
    key = jax.random.PRNGKey(0)
    k_obs, k_params, k_obs2, k_params2 = jax.random.split(key, 4)

    # --- Case 1: small shapes (masked squash path, f32 weights) --------------
    B, obs_dim, hidden_dim, action_dim = 8, 32, 32, 4
    obs = jax.random.normal(k_obs, (B, obs_dim), jnp.float32)
    params = init_params(k_params, obs_dim, hidden_dim, action_dim)
    prepared = prepare_params(params)                      # pad once, reuse
    mu, log_std = diag_gaussian_actor_forward(obs, prepared, log_std_bounds)
    mu, log_std = jax.block_until_ready((mu, log_std))
    mu_ref, ls_ref = reference_forward(obs, params, log_std_bounds)
    assert mu.shape == (B, action_dim) and log_std.shape == (B, action_dim)
    assert jnp.allclose(mu, mu_ref, atol=1e-5, rtol=1e-5)
    assert jnp.allclose(log_std, ls_ref, atol=1e-5, rtol=1e-5)

    # --- Case 2: bf16 weights + bf16 obs (recommended on v5e/v6e/v7x) --------
    # Note: obs is cast to bf16 before the first matmul (f32 accumulation); the
    # pure-JAX reference up-casts weights to f32, hence the loose tolerance.
    prepared_bf16 = prepare_params(params, dtype=jnp.bfloat16)
    mu16, ls16 = diag_gaussian_actor_forward(obs, prepared_bf16, log_std_bounds)
    mu16, ls16 = jax.block_until_ready((mu16, ls16))
    params_bf16 = tuple(a.astype(jnp.bfloat16) for a in params)
    mu_ref16, ls_ref16 = reference_forward(obs, params_bf16, log_std_bounds)
    assert mu16.shape == (B, action_dim) and ls16.shape == (B, action_dim)
    assert jnp.allclose(mu16, mu_ref16, atol=3e-1)
    assert jnp.allclose(ls16, ls_ref16, atol=3e-1)

    # --- Case 3: multi-step grid + split (lane-boundary) squash layout -------
    B2, obs_dim2, hidden_dim2, action_dim2 = 300, 24, 64, 128
    obs2 = jax.random.normal(k_obs2, (B2, obs_dim2), jnp.float32)
    params2 = init_params(k_params2, obs_dim2, hidden_dim2, action_dim2)
    prepared2 = prepare_params(params2)
    mu2, ls2 = diag_gaussian_actor_forward(obs2, prepared2, log_std_bounds)
    mu2, ls2 = jax.block_until_ready((mu2, ls2))
    mu2_ref, ls2_ref = reference_forward(obs2, params2, log_std_bounds)
    assert mu2.shape == (B2, action_dim2) and ls2.shape == (B2, action_dim2)
    assert jnp.allclose(mu2, mu2_ref, atol=1e-4, rtol=1e-4)
    assert jnp.allclose(ls2, ls2_ref, atol=1e-4, rtol=1e-4)

    print("KERNEL_OK")
</pallas_src>

<mosaic_0001>
module attributes {stable_mosaic.version = 11 : i64} {
  func.func @_actor_kernel(%arg0: i32, %arg1: memref<8x128xf32, #tpu.memory_space<vmem>>, %arg2: memref<128x128xf32, #tpu.memory_space<vmem>>, %arg3: memref<1x128xf32, #tpu.memory_space<vmem>>, %arg4: memref<128x128xf32, #tpu.memory_space<vmem>>, %arg5: memref<1x128xf32, #tpu.memory_space<vmem>>, %arg6: memref<128x128xf32, #tpu.memory_space<vmem>>, %arg7: memref<1x128xf32, #tpu.memory_space<vmem>>, %arg8: memref<8x128xf32, #tpu.memory_space<vmem>>) attributes {dimension_semantics = [#tpu.dimension_semantics<parallel>], iteration_bounds = array<i64: 1>, scalar_prefetch = 0 : i64, scratch_operands = 0 : i64, tpu.core_type = #tpu.core_type<tc>, window_params = [{transform_indices = @transform_0, window_bounds = array<i64: 8, 128>}, {pipeline_mode = #tpu.pipeline_mode<synchronous>, transform_indices = @transform_1, window_bounds = array<i64: 128, 128>}, {pipeline_mode = #tpu.pipeline_mode<synchronous>, transform_indices = @transform_2, window_bounds = array<i64: 1, 128>}, {pipeline_mode = #tpu.pipeline_mode<synchronous>, transform_indices = @transform_3, window_bounds = array<i64: 128, 128>}, {pipeline_mode = #tpu.pipeline_mode<synchronous>, transform_indices = @transform_4, window_bounds = array<i64: 1, 128>}, {pipeline_mode = #tpu.pipeline_mode<synchronous>, transform_indices = @transform_5, window_bounds = array<i64: 128, 128>}, {pipeline_mode = #tpu.pipeline_mode<synchronous>, transform_indices = @transform_6, window_bounds = array<i64: 1, 128>}, {transform_indices = @transform_7, window_bounds = array<i64: 8, 128>}]} {
    %c0 = arith.constant 0 : index
    %c0_0 = arith.constant 0 : index
    %0 = vector.load %arg1[%c0, %c0_0] : memref<8x128xf32, #tpu.memory_space<vmem>>, vector<8x128xf32>
    %c0_1 = arith.constant 0 : index
    %c0_2 = arith.constant 0 : index
    %1 = vector.load %arg2[%c0_1, %c0_2] : memref<128x128xf32, #tpu.memory_space<vmem>>, vector<128x128xf32>
    %cst = arith.constant dense<0.000000e+00> : vector<8x128xf32>
    %2 = tpu.matmul %0, %1, %cst {dimension_numbers = #tpu.dot_dimension_numbers<[1], [0], [0], [1], [0, 0, 1, 1], [], []>} : vector<8x128xf32>, vector<128x128xf32>, vector<8x128xf32> -> vector<8x128xf32>
    %c0_3 = arith.constant 0 : index
    %c0_4 = arith.constant 0 : index
    %3 = vector.load %arg3[%c0_3, %c0_4] : memref<1x128xf32, #tpu.memory_space<vmem>>, vector<1x128xf32>
    %4 = vector.broadcast %3 : vector<1x128xf32> to vector<8x128xf32>
    %5 = arith.addf %2, %4 : vector<8x128xf32>
    %cst_5 = arith.constant 0.000000e+00 : f32
    %6 = vector.broadcast %cst_5 : f32 to vector<8x128xf32>
    %7 = arith.maximumf %5, %6 : vector<8x128xf32>
    %c0_6 = arith.constant 0 : index
    %c0_7 = arith.constant 0 : index
    %8 = vector.load %arg4[%c0_6, %c0_7] : memref<128x128xf32, #tpu.memory_space<vmem>>, vector<128x128xf32>
    %cst_8 = arith.constant dense<0.000000e+00> : vector<8x128xf32>
    %9 = tpu.matmul %7, %8, %cst_8 {dimension_numbers = #tpu.dot_dimension_numbers<[1], [0], [0], [1], [0, 0, 1, 1], [], []>} : vector<8x128xf32>, vector<128x128xf32>, vector<8x128xf32> -> vector<8x128xf32>
    %c0_9 = arith.constant 0 : index
    %c0_10 = arith.constant 0 : index
    %10 = vector.load %arg5[%c0_9, %c0_10] : memref<1x128xf32, #tpu.memory_space<vmem>>, vector<1x128xf32>
    %11 = vector.broadcast %10 : vector<1x128xf32> to vector<8x128xf32>
    %12 = arith.addf %9, %11 : vector<8x128xf32>
    %cst_11 = arith.constant 0.000000e+00 : f32
    %13 = vector.broadcast %cst_11 : f32 to vector<8x128xf32>
    %14 = arith.maximumf %12, %13 : vector<8x128xf32>
    %c0_12 = arith.constant 0 : index
    %c0_13 = arith.constant 0 : index
    %15 = vector.load %arg6[%c0_12, %c0_13] : memref<128x128xf32, #tpu.memory_space<vmem>>, vector<128x128xf32>
    %cst_14 = arith.constant dense<0.000000e+00> : vector<8x128xf32>
    %16 = tpu.matmul %14, %15, %cst_14 {dimension_numbers = #tpu.dot_dimension_numbers<[1], [0], [0], [1], [0, 0, 1, 1], [], []>} : vector<8x128xf32>, vector<128x128xf32>, vector<8x128xf32> -> vector<8x128xf32>
    %c0_15 = arith.constant 0 : index
    %c0_16 = arith.constant 0 : index
    %17 = vector.load %arg7[%c0_15, %c0_16] : memref<1x128xf32, #tpu.memory_space<vmem>>, vector<1x128xf32>
    %18 = vector.broadcast %17 : vector<1x128xf32> to vector<8x128xf32>
    %19 = arith.addf %16, %18 : vector<8x128xf32>
    %20 = tpu.iota {dimensions = array<i32: 1>} : vector<8x128xi32>
    %c4_i32 = arith.constant 4 : i32
    %21 = vector.broadcast %c4_i32 : i32 to vector<8x128xi32>
    %22 = arith.cmpi sge, %20, %21 : vector<8x128xi32>
    %c8_i32 = arith.constant 8 : i32
    %23 = vector.broadcast %c8_i32 : i32 to vector<8x128xi32>
    %24 = arith.cmpi slt, %20, %23 : vector<8x128xi32>
    %25 = arith.andi %22, %24 : vector<8x128xi1>
    %26 = math.tanh %19 : vector<8x128xf32>
    %cst_17 = arith.constant 1.000000e+00 : f32
    %27 = vector.broadcast %cst_17 : f32 to vector<8x128xf32>
    %28 = arith.addf %26, %27 : vector<8x128xf32>
    %cst_18 = arith.constant 6.000000e+00 : f32
    %29 = vector.broadcast %cst_18 : f32 to vector<8x128xf32>
    %30 = arith.mulf %29, %28 : vector<8x128xf32>
    %cst_19 = arith.constant -1.000000e+01 : f32
    %31 = vector.broadcast %cst_19 : f32 to vector<8x128xf32>
    %32 = arith.addf %31, %30 : vector<8x128xf32>
    %33 = arith.select %25, %32, %19 : vector<8x128xi1>, vector<8x128xf32>
    %c0_20 = arith.constant 0 : index
    %c0_21 = arith.constant 0 : index
    %34 = vector.load %arg8[%c0_20, %c0_21] : memref<8x128xf32, #tpu.memory_space<vmem>>, vector<8x128xf32>
    tpu.vector_store %arg8[%c0_20, %c0_21], %33 {strides = array<i32>} : memref<8x128xf32, #tpu.memory_space<vmem>>, vector<8x128xf32>,
    return
  }
  func.func @transform_0(%arg0: i32) -> (i32, i32) {
    %c0_i32 = arith.constant 0 : i32
    %c0_i32_0 = arith.constant 0 : i32
    return %arg0, %c0_i32 : i32, i32
  }
  func.func @transform_1(%arg0: i32) -> (i32, i32) {
    %c0_i32 = arith.constant 0 : i32
    %c0_i32_0 = arith.constant 0 : i32
    %c0_i32_1 = arith.constant 0 : i32
    return %c0_i32, %c0_i32_0 : i32, i32
  }
  func.func @transform_2(%arg0: i32) -> (i32, i32) {
    %c0_i32 = arith.constant 0 : i32
    %c0_i32_0 = arith.constant 0 : i32
    %c0_i32_1 = arith.constant 0 : i32
    return %c0_i32, %c0_i32_0 : i32, i32
  }
  func.func @transform_3(%arg0: i32) -> (i32, i32) {
    %c0_i32 = arith.constant 0 : i32
    %c0_i32_0 = arith.constant 0 : i32
    %c0_i32_1 = arith.constant 0 : i32
    return %c0_i32, %c0_i32_0 : i32, i32
  }
  func.func @transform_4(%arg0: i32) -> (i32, i32) {
    %c0_i32 = arith.constant 0 : i32
    %c0_i32_0 = arith.constant 0 : i32
    %c0_i32_1 = arith.constant 0 : i32
    return %c0_i32, %c0_i32_0 : i32, i32
  }
  func.func @transform_5(%arg0: i32) -> (i32, i32) {
    %c0_i32 = arith.constant 0 : i32
    %c0_i32_0 = arith.constant 0 : i32
    %c0_i32_1 = arith.constant 0 : i32
    return %c0_i32, %c0_i32_0 : i32, i32
  }
  func.func @transform_6(%arg0: i32) -> (i32, i32) {
    %c0_i32 = arith.constant 0 : i32
    %c0_i32_0 = arith.constant 0 : i32
    %c0_i32_1 = arith.constant 0 : i32
    return %c0_i32, %c0_i32_0 : i32, i32
  }
  func.func @transform_7(%arg0: i32) -> (i32, i32) {
    %c0_i32 = arith.constant 0 : i32
    %c0_i32_0 = arith.constant 0 : i32
    return %arg0, %c0_i32 : i32, i32
  }
}

</mosaic_0001>

<bundles_post_ra>
// kernel: tpu_custom_call.1
= control target key start
LH: loop header
LB: loop body
LE: loop exit
PB: predicated region body
PF: predicated region fallthrough
CT: control target
= control target key end

     0   :  { %12 = vsyncpa [#allocation3], 0  ;;  %s804_s0 = inlined_call_operand.hbm [shape: f32[8,128], index: 0, kind: input, shape index: {}]   ;;  %s805_s1 = inlined_call_operand.hbm [shape: f32[128,128], index: 1, kind: input, shape index: {}]   ;;  %s806_s2 = inlined_call_operand.vmem [shape: f32[1,128], index: 2, kind: input, shape index: {}]   ;;  %s807_s3 = inlined_call_operand.hbm [shape: f32[128,128], index: 3, kind: input, shape index: {}]   ;;  %s808_s4 = inlined_call_operand.vmem [shape: f32[1,128], index: 4, kind: input, shape index: {}]   ;;  %s809_s5 = inlined_call_operand.hbm [shape: f32[128,128], index: 5, kind: input, shape index: {}]   ;;  %s810_s6 = inlined_call_operand.vmem [shape: f32[1,128], index: 6, kind: input, shape index: {}]   ;;  %s811_s7 = inlined_call_operand.hbm [shape: f32[8,128], index: 7, kind: output, shape index: {}]  }
   0x1   :  { %13 = vsyncpa [#allocation6], 0 }
   0x2   :  { %14 = vsyncpa [#allocation9], 0 }
   0x3   :  { %15 = vsyncpa [#allocation4], 0  ;;  %s668_s24 = smov [#allocation5]  }
   0x4   :  { %s31_s25 = sshll.u32 %s668_s24, 4  ;;  %s32_s25 = int_to_ptr.vmem [resolvable:$true] %s31_s25 }
   0x5   :  { %s568_s26 = scalar_lea.vmem %s32_s25, 2048  ;;  %p573_p1 = scmp.lt.s32.totalorder %s32_s25, %s32_s25 }
   0x6   :  { %p569_p0 = scmp.ne.s32.totalorder %s32_s25, %s568_s26  ;;  %p574_p2 = scmp.lt.s32.totalorder %s568_s26, %s568_s26 }
   0x8   :  { %p575_p3 = por %p574_p2, %p573_p1 }
   0xa   :  { %p576_p4 = pnand %p575_p3, %p569_p0 }
   0xc   :  { %579 = shalt.err (!%p576_p4)
}
   0xd   :  { %s669_s27 = smov 128   ;;  %s670_s28 = smov 8  }
   0xe   :  { %37 = dma.hbm_to_vmem [thread:$0]  %s805_s1, 2048, %s32_s25, [#allocation6], %s669_s27, %s669_s27, %s670_s28  }
   0xf   :  { %s671_s8 = smov [#allocation2]   ;;  %s672_s10 = smov [#allocation7]  }
  0x10   :  { %s22_s9 = sshll.u32 %s671_s8, 4  ;;  %s45_s11 = sshll.u32 %s672_s10, 4  ;;  %s23_s9 = int_to_ptr.vmem [resolvable:$true] %s22_s9  ;;  %s46_s11 = int_to_ptr.vmem [resolvable:$true] %s45_s11 }
  0x11   :  { %s588_s12 = scalar_lea.vmem %s23_s9, 128  ;;  %p593_p6 = scmp.lt.s32.totalorder %s23_s9, %s23_s9 }
  0x12   :  { %p589_p5 = scmp.ne.s32.totalorder %s23_s9, %s588_s12  ;;  %p594_p7 = scmp.lt.s32.totalorder %s588_s12, %s588_s12 }
  0x14   :  { %p595_p8 = por %p594_p7, %p593_p6 }
  0x16   :  { %p596_p9 = pnand %p595_p8, %p589_p5 }
  0x18   :  { %599 = shalt.err (!%p596_p9)
}
  0x19   :  { %25 = dma.hbm_to_vmem [thread:$0]  %s804_s0, 128, %s23_s9, [#allocation3]  }
  0x1a   :  { %s608_s15 = scalar_lea.vmem %s46_s11, 2048  ;;  %p613_p11 = scmp.lt.s32.totalorder %s46_s11, %s46_s11 }
  0x1b   :  { %p609_p10 = scmp.ne.s32.totalorder %s46_s11, %s608_s15  ;;  %p614_p12 = scmp.lt.s32.totalorder %s608_s15, %s608_s15 }
  0x1d   :  { %p615_p13 = por %p614_p12, %p613_p11 }
  0x1f   :  { %p616_p0 = pnand %p615_p13, %p609_p10 }
  0x21   :  { %619 = shalt.err (!%p616_p0)
}
  0x22   :  { %51 = dma.hbm_to_vmem [thread:$0]  %s807_s3, 2048, %s46_s11, [#allocation6], %s669_s27, %s669_s27, %s670_s28  }
  0x23   :  { %s673_s17 = smov [#allocation8]  }
  0x24   :  { %s59_s18 = sshll.u32 %s673_s17, 4  ;;  %s60_s18 = int_to_ptr.vmem [resolvable:$true] %s59_s18 }
  0x25   :  { %s628_s19 = scalar_lea.vmem %s60_s18, 2048  ;;  %p633_p2 = scmp.lt.s32.totalorder %s60_s18, %s60_s18 }
  0x26   :  { %p629_p1 = scmp.ne.s32.totalorder %s60_s18, %s628_s19  ;;  %p634_p3 = scmp.lt.s32.totalorder %s628_s19, %s628_s19 }
  0x28   :  { %p635_p4 = por %p634_p3, %p633_p2 }
  0x2a   :  { %p636_p5 = pnand %p635_p4, %p629_p1 }
  0x2c   :  { %639 = shalt.err (!%p636_p5)
}
  0x2d   :  { %65 = dma.hbm_to_vmem [thread:$0]  %s809_s5, 2048, %s60_s18, [#allocation9], %s669_s27, %s669_s27, %s670_s28  }
  0x2e   :  { %660 = dma.done.wait [#allocation3], 128  }
  0x2f   :  { %661 = vsyncadd [#allocation3], 4294967168 }
  0x30   :  { %662 = dma.done.wait [#allocation6], 4096  }
  0x31   :  { %663 = vsyncadd [#allocation6], 4294963200 }
  0x32   :  { %664 = dma.done.wait [#allocation9], 2048  }
  0x33   :  { %665 = vsyncadd [#allocation9], 4294965248  ;;  %v674_v0 = vmov 0.0   ;;  %vm675_vm0 = vmmov 0   ;;  %v96_v1 = vld [vmem:[#allocation5 + $0x78] sm:$0xff]  ;;  %v95_v2 = vld [vmem:[#allocation5 + $0x70] sm:$0xff] }
  0x34   :  { %444 = vmatprep.subr.mxu0 %v674_v0  ;;  %476 = vmatprep.mubr.msk.f32.mxu0 %vm675_vm0, %v674_v0  ;;  %v94_v3 = vld [vmem:[#allocation5 + $0x68] sm:$0xff]  ;;  %v93_v4 = vld [vmem:[#allocation5 + $0x60] sm:$0xff]  ;;  %v190_v5 = vld [vmem:[#allocation7 + $0x78] sm:$0xff] }
  0x35   :  { %479 = vmatprep.subr.mxu1 %v674_v0  ;;  %511 = vmatprep.mubr.msk.f32.mxu1 %vm675_vm0, %v674_v0  ;;  %v92_v6 = vld [vmem:[#allocation5 + $0x58] sm:$0xff]  ;;  %v189_v7 = vld [vmem:[#allocation7 + $0x70] sm:$0xff]  ;;  %v188_v8 = vld [vmem:[#allocation7 + $0x68] sm:$0xff] }
  0x36   :  { %445 = vmatpush3.msra.mxu0 %v96_v1  ;;  %480 = vmatpush3.msra.mxu1 %v190_v5  ;;  %v91_v9 = vld [vmem:[#allocation5 + $0x50] sm:$0xff]  ;;  %v187_v10 = vld [vmem:[#allocation7 + $0x60] sm:$0xff]  ;;  %v90_v11 = vld [vmem:[#allocation5 + $0x48] sm:$0xff] }
  0x37   :  { %446 = vmatprep.subr.mxu0 %v674_v0  ;;  %481 = vmatprep.subr.mxu1 %v674_v0  ;;  %v186_v12 = vld [vmem:[#allocation7 + $0x58] sm:$0xff]  ;;  %v89_v13 = vld [vmem:[#allocation5 + $0x40] sm:$0xff]  ;;  %v185_v14 = vld [vmem:[#allocation7 + $0x50] sm:$0xff] }
  0x38   :  { %447 = vmatpush3.msra.mxu0 %v95_v2  ;;  %482 = vmatpush3.msra.mxu1 %v189_v7  ;;  %v88_v15 = vld [vmem:[#allocation5 + $0x38] sm:$0xff]  ;;  %v184_v16 = vld [vmem:[#allocation7 + $0x48] sm:$0xff]  ;;  %v87_v17 = vld [vmem:[#allocation5 + $0x30] sm:$0xff] }
  0x39   :  { %448 = vmatprep.subr.mxu0 %v674_v0  ;;  %483 = vmatprep.subr.mxu1 %v674_v0  ;;  %v183_v18 = vld [vmem:[#allocation7 + $0x40] sm:$0xff]  ;;  %v86_v19 = vld [vmem:[#allocation5 + $0x28] sm:$0xff]  ;;  %v182_v20 = vld [vmem:[#allocation7 + $0x38] sm:$0xff] }
  0x3a   :  { %449 = vmatpush3.msra.mxu0 %v94_v3  ;;  %484 = vmatpush3.msra.mxu1 %v188_v8  ;;  %v85_v21 = vld [vmem:[#allocation5 + $0x20] sm:$0xff]  ;;  %v181_v22 = vld [vmem:[#allocation7 + $0x30] sm:$0xff]  ;;  %v84_v23 = vld [vmem:[#allocation5 + $0x18] sm:$0xff] }
  0x3b   :  { %450 = vmatprep.subr.mxu0 %v674_v0  ;;  %485 = vmatprep.subr.mxu1 %v674_v0  ;;  %v180_v24 = vld [vmem:[#allocation7 + $0x28] sm:$0xff]  ;;  %v83_v25 = vld [vmem:[#allocation5 + $0x10] sm:$0xff]  ;;  %v179_v26 = vld [vmem:[#allocation7 + $0x20] sm:$0xff] }
  0x3c   :  { %451 = vmatpush3.msra.mxu0 %v93_v4  ;;  %486 = vmatpush3.msra.mxu1 %v187_v10  ;;  %v82_v27 = vld [vmem:[#allocation5 + $0x8] sm:$0xff]  ;;  %v178_v28 = vld [vmem:[#allocation7 + $0x18] sm:$0xff]  ;;  %v81_v29 = vld [vmem:[#allocation5] sm:$0xff] }
  0x3d   :  { %452 = vmatprep.subr.mxu0 %v674_v0  ;;  %487 = vmatprep.subr.mxu1 %v674_v0  ;;  %v80_v30 = vld [vmem:[#allocation2] sm:$0xff]  ;;  %v177_v31 = vld [vmem:[#allocation7 + $0x10] sm:$0xff]  ;;  %v176_v32 = vld [vmem:[#allocation7 + $0x8] sm:$0xff] }
  0x3e   :  { %453 = vmatpush3.msra.mxu0 %v92_v6  ;;  %488 = vmatpush3.msra.mxu1 %v186_v12  ;;  %v175_v33 = vld [vmem:[#allocation7] sm:$0xff]  ;;  %v284_v34 = vld [vmem:[#allocation8 + $0x78] sm:$0xff]  ;;  %v283_v35 = vld [vmem:[#allocation8 + $0x70] sm:$0xff] }
  0x3f   :  { %454 = vmatprep.subr.mxu0 %v674_v0  ;;  %489 = vmatprep.subr.mxu1 %v674_v0  ;;  %v282_v36 = vld [vmem:[#allocation8 + $0x68] sm:$0xff]  ;;  %v281_v37 = vld [vmem:[#allocation8 + $0x60] sm:$0xff]  ;;  %v280_v38 = vld [vmem:[#allocation8 + $0x58] sm:$0xff] }
  0x40   :  { %455 = vmatpush3.msra.mxu0 %v91_v9  ;;  %490 = vmatpush3.msra.mxu1 %v185_v14  ;;  %v279_v39 = vld [vmem:[#allocation8 + $0x50] sm:$0xff]  ;;  %v278_v40 = vld [vmem:[#allocation8 + $0x48] sm:$0xff]  ;;  %v277_v41 = vld [vmem:[#allocation8 + $0x40] sm:$0xff] }
  0x41   :  { %456 = vmatprep.subr.mxu0 %v674_v0  ;;  %491 = vmatprep.subr.mxu1 %v674_v0  ;;  %v276_v42 = vld [vmem:[#allocation8 + $0x38] sm:$0xff]  ;;  %v275_v43 = vld [vmem:[#allocation8 + $0x30] sm:$0xff]  ;;  %v274_v44 = vld [vmem:[#allocation8 + $0x28] sm:$0xff] }
  0x42   :  { %457 = vmatpush3.msra.mxu0 %v90_v11  ;;  %492 = vmatpush3.msra.mxu1 %v184_v16  ;;  %v273_v45 = vld [vmem:[#allocation8 + $0x20] sm:$0xff]  ;;  %v272_v46 = vld [vmem:[#allocation8 + $0x18] sm:$0xff]  ;;  %v271_v52 = vld [vmem:[#allocation8 + $0x10] sm:$0xff] }
  0x43   :  { %458 = vmatprep.subr.mxu0 %v674_v0  ;;  %493 = vmatprep.subr.mxu1 %v674_v0  ;;  %v390_v47 = vld [vmem:[%s806_s2] ss:$0 sm:$0xff]  ;;  %v270_v53 = vld [vmem:[#allocation8 + $0x8] sm:$0xff]  ;;  %v269_v54 = vld [vmem:[#allocation8] sm:$0xff] }
  0x44   :  { %459 = vmatpush3.msra.mxu0 %v89_v13  ;;  %494 = vmatpush3.msra.mxu1 %v183_v18  ;;  %v391_v55 = vld [vmem:[%s808_s4] ss:$0 sm:$0xff]  ;;  %s676_s4 = smov [#allocation10]  }
  0x45   :  { %460 = vmatprep.subr.mxu0 %v674_v0  ;;  %495 = vmatprep.subr.mxu1 %v674_v0  ;;  %v392_v60 = vld [vmem:[%s810_s6] ss:$0 sm:$0xff]  ;;  %s379_s24 = sshll.u32 %s676_s4, 4  ;;  %s380_s24 = int_to_ptr.vmem [resolvable:$true] %s379_s24 }
  0x46   :  { %461 = vmatpush3.msra.mxu0 %v88_v15  ;;  %496 = vmatpush3.msra.mxu1 %v182_v20  ;;  %s640_s25 = scalar_lea.vmem %s380_s24, 128  ;;  %p645_p7 = scmp.lt.s32.totalorder %s380_s24, %s380_s24 }
  0x47   :  { %462 = vmatprep.subr.mxu0 %v674_v0  ;;  %497 = vmatprep.subr.mxu1 %v674_v0  ;;  %p641_p6 = scmp.ne.s32.totalorder %s380_s24, %s640_s25  ;;  %p646_p8 = scmp.lt.s32.totalorder %s640_s25, %s640_s25 }
  0x48   :  { %463 = vmatpush3.msra.mxu0 %v87_v17  ;;  %498 = vmatpush3.msra.mxu1 %v181_v22 }
  0x49   :  { %464 = vmatprep.subr.mxu0 %v674_v0  ;;  %499 = vmatprep.subr.mxu1 %v674_v0  ;;  %p647_p9 = por %p646_p8, %p645_p7 }
  0x4a   :  { %465 = vmatpush3.msra.mxu0 %v86_v19  ;;  %500 = vmatpush3.msra.mxu1 %v180_v24 }
  0x4b   :  { %466 = vmatprep.subr.mxu0 %v674_v0  ;;  %501 = vmatprep.subr.mxu1 %v674_v0  ;;  %p648_p10 = pnand %p647_p9, %p641_p6 }
  0x4c   :  { %467 = vmatpush3.msra.mxu0 %v85_v21  ;;  %502 = vmatpush3.msra.mxu1 %v179_v26 }
  0x4d   :  { %468 = vmatprep.subr.mxu0 %v674_v0  ;;  %503 = vmatprep.subr.mxu1 %v674_v0 }
  0x4e   :  { %469 = vmatpush3.msra.mxu0 %v84_v23  ;;  %504 = vmatpush3.msra.mxu1 %v178_v28 }
  0x4f   :  { %470 = vmatprep.subr.mxu0 %v674_v0  ;;  %505 = vmatprep.subr.mxu1 %v674_v0 }
  0x50   :  { %471 = vmatpush3.msra.mxu0 %v83_v25  ;;  %506 = vmatpush3.msra.mxu1 %v177_v31 }
  0x51   :  { %472 = vmatprep.subr.mxu0 %v674_v0  ;;  %507 = vmatprep.subr.mxu1 %v674_v0 }
  0x52   :  { %473 = vmatpush3.msra.mxu0 %v82_v27  ;;  %508 = vmatpush3.msra.mxu1 %v176_v32 }
  0x53   :  { %474 = vmatprep.subr.mxu0 %v674_v0  ;;  %509 = vmatprep.subr.mxu1 %v674_v0 }
  0x54   :  { %475 = vmatpush3.msra.mxu0 %v81_v29  ;;  %510 = vmatpush3.msra.mxu1 %v175_v33 }
  0x55   :  { %477 = vmatmul.mubr.f32.vlgmr.msra.gmra.mxu0 %v80_v30  ;;  %514 = vmatprep.subr.mxu0 %v674_v0 }
  0x56   :  { %546 = vmatprep.mubr.msk.f32.mxu0 %vm675_vm0, %v674_v0  ;;  %515 = vmatpush3.msra.mxu0 %v284_v34 }
  0x57   :  { %516 = vmatprep.subr.mxu0 %v674_v0 }
  0x58   :  { %517 = vmatpush3.msra.mxu0 %v283_v35 }
  0x59   :  { %518 = vmatprep.subr.mxu0 %v674_v0 }
  0x5a   :  { %519 = vmatpush3.msra.mxu0 %v282_v36 }
  0x5b   :  { %520 = vmatprep.subr.mxu0 %v674_v0 }
  0x5c   :  { %521 = vmatpush3.msra.mxu0 %v281_v37 }
  0x5d   :  { %522 = vmatprep.subr.mxu0 %v674_v0 }
  0x5e   :  { %523 = vmatpush3.msra.mxu0 %v280_v38 }
  0x5f   :  { %524 = vmatprep.subr.mxu0 %v674_v0 }
  0x60   :  { %525 = vmatpush3.msra.mxu0 %v279_v39 }
  0x61   :  { %526 = vmatprep.subr.mxu0 %v674_v0 }
  0x62   :  { %527 = vmatpush3.msra.mxu0 %v278_v40 }
  0x63   :  { %528 = vmatprep.subr.mxu0 %v674_v0 }
  0x64   :  { %529 = vmatpush3.msra.mxu0 %v277_v41 }
  0x65   :  { %530 = vmatprep.subr.mxu0 %v674_v0 }
  0x66   :  { %531 = vmatpush3.msra.mxu0 %v276_v42 }
  0x67   :  { %532 = vmatprep.subr.mxu0 %v674_v0 }
  0x68   :  { %533 = vmatpush3.msra.mxu0 %v275_v43 }
  0x69   :  { %534 = vmatprep.subr.mxu0 %v674_v0 }
  0x6a   :  { %535 = vmatpush3.msra.mxu0 %v274_v44 }
  0x6b   :  { %536 = vmatprep.subr.mxu0 %v674_v0 }
  0x6c   :  { %537 = vmatpush3.msra.mxu0 %v273_v45 }
  0x6d   :  { %538 = vmatprep.subr.mxu0 %v674_v0 }
  0x6e   :  { %539 = vmatpush3.msra.mxu0 %v272_v46 }
  0x6f   :  { %540 = vmatprep.subr.mxu0 %v674_v0 }
  0x70   :  { %541 = vmatpush3.msra.mxu0 %v271_v52 }
  0x71   :  { %542 = vmatprep.subr.mxu0 %v674_v0 }
  0x72   :  { %543 = vmatpush3.msra.mxu0 %v270_v53 }
  0x73   :  { %544 = vmatprep.subr.mxu0 %v674_v0  ;;  %v362_v0 = vlaneseq }
  0x74   :  { %545 = vmatpush3.msra.mxu0 %v269_v54 }
  0x75   :  { %v363_v1 = vand.u32 127, %v362_v0 }
  0x77   :  { %vm364_vm1 = vcmp.ge.s32.totalorder %v363_v1, 4  ;;  %vm365_vm2 = vcmp.lt.s32.totalorder %v363_v1, 8 }
  0x78   :  { %vm366_vm3 = vmand %vm364_vm1, %vm365_vm2 }
 0x115   :  { %v170_v48 = vpop.f32.mrf.mxu0 }
 0x116   :  { %v171_v49 = vadd.f32 %v390_v47, %v170_v48 }
 0x117   :  { %v478_v50 = vpop.f32.mrf.mxu0 }
 0x118   :  { %v174_v51 = vmax.f32 %v171_v49, 0.0 }
 0x11a   :  { %512 = vmatmul.mubr.f32.vlgmr.msra.gmra.mxu1 %v174_v51 }
 0x1da   :  { %v264_v56 = vpop.f32.mrf.mxu1 }
 0x1db   :  { %v265_v57 = vadd.f32 %v391_v55, %v264_v56 }
 0x1dc   :  { %v513_v58 = vpop.f32.mrf.mxu1 }
 0x1dd   :  { %v268_v59 = vmax.f32 %v265_v57, 0.0 }
 0x1df   :  { %547 = vmatmul.mubr.f32.vlgmr.msra.gmra.mxu0 %v268_v59 }
 0x29f   :  { %v358_v61 = vpop.f32.mrf.mxu0 }
 0x2a0   :  { %v359_v62 = vadd.f32 %v392_v60, %v358_v61 }
 0x2a1   :  { %v548_v63 = vpop.f32.mrf.mxu0 }
 0x2a2   :  { %558 = vtanh.f32 %v359_v62 }
 0x2af   :  { %v559_v2 = vpop.eup %558 }
 0x2b0   :  { %v368_v3 = vadd.f32 1.0, %v559_v2 }
 0x2b2   :  { %v369_v4 = vmul.f32 6.0, %v368_v3 }
 0x2b4   :  { %v370_v5 = vadd.f32 -10.0, %v369_v4 }
 0x2b6   :  { %v371_v6 = vsel %vm366_vm3, %v370_v5, %v359_v62 }
 0x2b7   :  { %372 = vst [vmem:[#allocation10] sm:$0xff] %v371_v6 }
 0x2b8   :  { %651 = shalt.err (!%p648_p10)
}
 0x2b9   :  { %382 = dma.vmem_to_hbm [thread:$0]  %s380_s24, 128, %s811_s7, [#allocation4]  }
 0x2ba   :  { %666 = dma.done.wait [#allocation4], 128  }
 0x2bb   :  { %667 = vsyncadd [#allocation4], 4294967168 }
 0x2bc   :  { %386 = vsyncpa [#allocation3], 1 }
 0x2bd   :  { %387 = vsyncpa [#allocation6], 1 }
 0x2be   :  { %388 = vsyncpa [#allocation9], 1 }
 0x2bf   :  { %389 = vsyncpa [#allocation4], 1 }

</bundles_post_ra>
